<compile_context>
chip_gen: v6e
topology: v6e:2x2x1
jax: 0.10.0
libtpu: 0.0.40
codegen_flags: <defaults>
</compile_context>

<pallas_src>
import functools

import jax
import jax.numpy as jnp
from jax.experimental import pallas as pl
from jax.experimental.pallas import tpu as pltpu


def _coord_latent_kernel(xc_ref, hz_ref, wc_ref, out_ref, *, use_tanh: bool):
    """One grid step processes TB batch elements.

    xc_ref : (TB, N, 2)   coordinates for this batch tile
    hz_ref : (TB, 1, Dp)  precomputed z @ w_latent + b_coord (lane-padded)
    wc_ref : (2, 1, Dp)   fc_coord weight (transposed, lane-padded), resident
    out_ref: (TB, N, Dp)  output tile (lane-dense: Dp % 128 == 0)
    """
    xc = xc_ref[...]                               # (TB, N, 2)
    hz = hz_ref[...]                               # (TB, 1, Dp)
    w0 = wc_ref[0:1]                               # (1, 1, Dp)
    w1 = wc_ref[1:2]                               # (1, 1, Dp)

    # fc_coord on the VPU: K=2 contraction as two broadcast FMAs (no MXU).
    h = xc[:, :, 0:1] * w0 + xc[:, :, 1:2] * w1    # (TB, N, Dp)
    h = h + hz                                     # broadcast over the N rows
    if use_tanh:
        h = jnp.tanh(h)                            # EUP
    out_ref[...] = h.astype(out_ref.dtype)


def _round_up(x, m):
    return (x + m - 1) // m * m


def _pick_tb(B, N, Dp, target_bytes=4 << 20):
    """Largest batch tile TB that divides B, keeps the f32 output tile under
    `target_bytes`, and (when B > 1) leaves >= 2 grid steps for megacore."""
    best = 1
    for tb in range(1, B + 1):
        if B % tb:
            continue
        if B > 1 and (B // tb) < 2:
            continue
        if tb * N * Dp * 4 <= target_bytes:
            best = tb
    return best


def coord_latent_forward(x_coord, z, w_coord, b_coord, w_latent,
                         activation: bool = False):
    """Pallas implementation of coord_latent.forward.

    x_coord  : (B, N, 2)   float32
    z        : (B, L)      float32
    w_coord  : (2, D)      fc_coord weight, stored transposed
    b_coord  : (1, D)      fc_coord bias
    w_latent : (L, D)      fc_latent weight, stored transposed (no bias)
    returns  : (B*N, D)    float32
    """
    B, N, _ = x_coord.shape
    L = z.shape[1]
    D = w_coord.shape[1]
    Dp = _round_up(max(D, 128), 128)           # lane-dense output width

    # Hoisted latent term (tiny matmul, done once): (B, 1, D).
    hz = (z @ w_latent + b_coord).reshape(B, 1, D)

    # Zero-pad the feature dim so in-kernel stores are unmasked 128-lane vst.
    if Dp != D:
        hz = jnp.pad(hz, ((0, 0), (0, 0), (0, Dp - D)))
        wc = jnp.pad(w_coord, ((0, 0), (0, Dp - D)))
    else:
        wc = w_coord
    wc = wc.reshape(2, 1, Dp)                  # avoid in-kernel reshapes

    TB = _pick_tb(B, N, Dp)
    grid = (B // TB,)

    kernel = functools.partial(_coord_latent_kernel, use_tanh=activation)

    # Advisory cost for the XLA scheduler.
    flops = 2 * B * N * 2 * D + 2 * B * L * D + B * N * D
    transcendentals = B * N * D if activation else 0
    bytes_accessed = 4 * (B * N * 2 + B * Dp + 2 * Dp + B * N * Dp)
    cost = pl.CostEstimate(flops=flops, transcendentals=transcendentals,
                           bytes_accessed=bytes_accessed)

    # Explicit VMEM budget: double-buffered tiles + resident weight + slack.
    in_tile = TB * N * 2 * 4
    hz_tile = TB * Dp * 4
    out_tile = TB * N * Dp * 4
    vmem_limit = int(min(
        max(2 * (in_tile + hz_tile + out_tile) + 2 * Dp * 4 + (2 << 20),
            8 << 20),
        32 << 20))

    out = pl.pallas_call(
        kernel,
        out_shape=jax.ShapeDtypeStruct((B, N, Dp), jnp.float32),
        grid_spec=pltpu.PrefetchScalarGridSpec(
            num_scalar_prefetch=0,
            grid=grid,
            in_specs=[
                # per-step batch tile of coordinates
                pl.BlockSpec((TB, N, 2), lambda b: (b, 0, 0)),
                # per-step tile of the precomputed latent term
                pl.BlockSpec((TB, 1, Dp), lambda b: (b, 0, 0)),
                # small weight: fully resident across the grid
                pl.BlockSpec((2, 1, Dp), lambda b: (0, 0, 0)),
            ],
            out_specs=pl.BlockSpec((TB, N, Dp), lambda b: (b, 0, 0)),
        ),
        compiler_params=pltpu.CompilerParams(
            dimension_semantics=("parallel",),
            vmem_limit_bytes=vmem_limit),
        cost_estimate=cost,
    )(x_coord, hz, wc)

    if Dp != D:
        out = out[:, :, :D]
    return out.reshape(B * N, D)


def coord_latent_reference(x_coord, z, w_coord, b_coord, w_latent,
                           activation: bool = False):
    """Pure-JAX reference mirroring the PyTorch module."""
    B, N, _ = x_coord.shape
    h_x = x_coord.reshape(B * N, 2) @ w_coord + b_coord      # (B*N, D)
    h_x = h_x.reshape(B, N, -1)
    h_z = z @ w_latent                                       # (B, D)
    h = h_x + h_z[:, None, :]
    h = h.reshape(B * N, -1)
    if activation:
        h = jnp.tanh(h)
    return h


if __name__ == "__main__":
    # Small, module-consistent shapes.
    B, N = 2, 64            # batch, number of coordinate points (e.g. 8x8 grid)
    latent_dim = 4          # "content" latent dims
    out_dim = 32            # hidden units of the decoder's first layer
    activation = True       # exercise the tanh branch

    key = jax.random.PRNGKey(0)
    k_xc, k_z, k_wc, k_bc, k_wl = jax.random.split(key, 5)

    # Inputs.
    x_coord = jax.random.normal(k_xc, (B, N, 2), dtype=jnp.float32)
    z = jax.random.normal(k_z, (B, latent_dim), dtype=jnp.float32)

    # Parameters (shapes follow nn.Linear(2, D) and nn.Linear(L, D, bias=False);
    # stored transposed for right-multiplication).
    w_coord = jax.random.normal(k_wc, (2, out_dim), dtype=jnp.float32) * 0.5
    b_coord = jax.random.normal(k_bc, (1, out_dim), dtype=jnp.float32) * 0.1
    w_latent = jax.random.normal(k_wl, (latent_dim, out_dim),
                                 dtype=jnp.float32) * 0.5

    out = coord_latent_forward(x_coord, z, w_coord, b_coord, w_latent,
                               activation=activation)
    out = jax.block_until_ready(out)

    ref = coord_latent_reference(x_coord, z, w_coord, b_coord, w_latent,
                                 activation=activation)
    assert out.shape == (B * N, out_dim)
    assert jnp.allclose(out, ref, atol=1e-5, rtol=1e-5)

    print("KERNEL_OK")
</pallas_src>

<mosaic_0001>
module attributes {stable_mosaic.version = 11 : i64} {
  func.func @_coord_latent_kernel(%arg0: i32, %arg1: memref<1x64x2xf32, #tpu.memory_space<vmem>>, %arg2: memref<1x1x128xf32, #tpu.memory_space<vmem>>, %arg3: memref<2x1x128xf32, #tpu.memory_space<vmem>>, %arg4: memref<1x64x128xf32, #tpu.memory_space<vmem>>) attributes {dimension_semantics = [#tpu.dimension_semantics<parallel>], iteration_bounds = array<i64: 2>, scalar_prefetch = 0 : i64, scratch_operands = 0 : i64, tpu.core_type = #tpu.core_type<tc>, window_params = [{transform_indices = @transform_0, window_bounds = array<i64: 1, 64, 2>}, {transform_indices = @transform_1, window_bounds = array<i64: 1, 1, 128>}, {pipeline_mode = #tpu.pipeline_mode<synchronous>, transform_indices = @transform_2, window_bounds = array<i64: 2, 1, 128>}, {transform_indices = @transform_3, window_bounds = array<i64: 1, 64, 128>}]} {
    %c0 = arith.constant 0 : index
    %c0_0 = arith.constant 0 : index
    %c0_1 = arith.constant 0 : index
    %0 = vector.load %arg1[%c0, %c0_0, %c0_1] : memref<1x64x2xf32, #tpu.memory_space<vmem>>, vector<1x64x2xf32>
    %c0_2 = arith.constant 0 : index
    %c0_3 = arith.constant 0 : index
    %c0_4 = arith.constant 0 : index
    %1 = vector.load %arg2[%c0_2, %c0_3, %c0_4] : memref<1x1x128xf32, #tpu.memory_space<vmem>>, vector<1x1x128xf32>
    %c0_5 = arith.constant 0 : index
    %c0_6 = arith.constant 0 : index
    %c0_7 = arith.constant 0 : index
    %2 = vector.load %arg3[%c0_5, %c0_6, %c0_7] : memref<2x1x128xf32, #tpu.memory_space<vmem>>, vector<1x1x128xf32>
    %c1 = arith.constant 1 : index
    %c0_8 = arith.constant 0 : index
    %c0_9 = arith.constant 0 : index
    %3 = vector.load %arg3[%c1, %c0_8, %c0_9] : memref<2x1x128xf32, #tpu.memory_space<vmem>>, vector<1x1x128xf32>
    %4 = vector.extract_strided_slice %0 {offsets = [0, 0, 0], sizes = [1, 64, 1], strides = [1, 1, 1]} : vector<1x64x2xf32> to vector<1x64x1xf32>
    %5 = vector.broadcast %4 : vector<1x64x1xf32> to vector<1x64x128xf32>
    %6 = vector.broadcast %2 : vector<1x1x128xf32> to vector<1x64x128xf32>
    %7 = arith.mulf %5, %6 : vector<1x64x128xf32>
    %8 = vector.extract_strided_slice %0 {offsets = [0, 0, 1], sizes = [1, 64, 1], strides = [1, 1, 1]} : vector<1x64x2xf32> to vector<1x64x1xf32>
    %9 = vector.broadcast %8 : vector<1x64x1xf32> to vector<1x64x128xf32>
    %10 = vector.broadcast %3 : vector<1x1x128xf32> to vector<1x64x128xf32>
    %11 = arith.mulf %9, %10 : vector<1x64x128xf32>
    %12 = arith.addf %7, %11 : vector<1x64x128xf32>
    %13 = vector.broadcast %1 : vector<1x1x128xf32> to vector<1x64x128xf32>
    %14 = arith.addf %12, %13 : vector<1x64x128xf32>
    %15 = math.tanh %14 : vector<1x64x128xf32>
    %c0_10 = arith.constant 0 : index
    %c0_11 = arith.constant 0 : index
    %c0_12 = arith.constant 0 : index
    %16 = vector.load %arg4[%c0_10, %c0_11, %c0_12] : memref<1x64x128xf32, #tpu.memory_space<vmem>>, vector<1x64x128xf32>
    tpu.vector_store %arg4[%c0_10, %c0_11, %c0_12], %15 {strides = array<i32>} : memref<1x64x128xf32, #tpu.memory_space<vmem>>, vector<1x64x128xf32>,
    return
  }
  func.func @transform_0(%arg0: i32) -> (i32, i32, i32) {
    %c0_i32 = arith.constant 0 : i32
    %c0_i32_0 = arith.constant 0 : i32
    %c0_i32_1 = arith.constant 0 : i32
    return %arg0, %c0_i32, %c0_i32_0 : i32, i32, i32
  }
  func.func @transform_1(%arg0: i32) -> (i32, i32, i32) {
    %c0_i32 = arith.constant 0 : i32
    %c0_i32_0 = arith.constant 0 : i32
    %c0_i32_1 = arith.constant 0 : i32
    return %arg0, %c0_i32, %c0_i32_0 : i32, i32, i32
  }
  func.func @transform_2(%arg0: i32) -> (i32, i32, i32) {
    %c0_i32 = arith.constant 0 : i32
    %c0_i32_0 = arith.constant 0 : i32
    %c0_i32_1 = arith.constant 0 : i32
    %c0_i32_2 = arith.constant 0 : i32
    return %c0_i32, %c0_i32_0, %c0_i32_1 : i32, i32, i32
  }
  func.func @transform_3(%arg0: i32) -> (i32, i32, i32) {
    %c0_i32 = arith.constant 0 : i32
    %c0_i32_0 = arith.constant 0 : i32
    %c0_i32_1 = arith.constant 0 : i32
    return %arg0, %c0_i32, %c0_i32_0 : i32, i32, i32
  }
}

</mosaic_0001>

<bundles_post_ra>
// kernel: tpu_custom_call.1
= control target key start
LH: loop header
LB: loop body
LE: loop exit
PB: predicated region body
PF: predicated region fallthrough
CT: control target
= control target key end

     0   :  { %8 = vsyncpa [#allocation3], 0  ;;  %s705_s0 = inlined_call_operand.vmem [shape: f32[2,64,2], index: 0, kind: input, shape index: {}]   ;;  %s706_s1 = inlined_call_operand.vmem [shape: f32[2,1,128], index: 1, kind: input, shape index: {}]   ;;  %s707_s2 = inlined_call_operand.vmem [shape: f32[2,1,128], index: 2, kind: input, shape index: {}]   ;;  %s708_s3 = inlined_call_operand.hbm [shape: f32[2,64,128], index: 3, kind: output, shape index: {}]  }
   0x1   :  { %10 = vsyncpa [#allocation3 + $0x1], 0  ;;  %s586_s12 = smov 0   ;;  %s588_s13 = smov 0  }
   0x2   :  { %s590_s14 = smov 0   ;;  %s592_s15 = smov 0  }
   0x3 LB: > { %s607_s16 = sadd.s32 4294967295, %s559_s15   ;;  %s418_s17 = sadd.s32 4294967294, %s559_s15   ;;  %s559_s15 = sphi %s592_s15, %s714_s15   ;;  %s555_s14 = sphi %s590_s14, %s713_s14   ;;  %s551_s13 = sphi %s588_s13, %s712_s13   ;;  %s547_s12 = sphi %s586_s12, %s711_s12  }
   0x4   : > { %s611_s18 = sadd.s32 1, %s559_s15   ;;  %s96_s19 = sadd.s32 1, %s555_s14 }
   0x5   : > { %s93_s20 = ssub.s32 %s559_s15, %s611_s18  ;;  %p106_p0 = scmp.ne.s32.totalorder %s555_s14, %s551_s13 }
   0x6   : > { %p94_p1 = scmp.eq.s32.totalorder %s93_s20, 0  ;;  %p107_p2 = scmp.eq.s32.totalorder %s607_s16, 1 }
   0x7   : > { %p112_p3 = scmp.ne.s32.totalorder %s551_s13, %s547_s12  ;;  %p113_p4 = scmp.eq.s32.totalorder %s418_s17, 1 }
   0x8   : > { %s622_s21 = scalar_select %p94_p1, %s555_s14, %s96_s19  }
   0x9   : > { %p624_p5 = por %p107_p2, %p106_p0  ;;  %p628_p6 = por %p113_p4, %p112_p3 }
   0xa   : > { %p421_p7 = scmp.ge.s32.totalorder %s559_s15, 1  ;;  %p148_p8 = scmp.lt.s32.totalorder %s559_s15, 3 }
   0xc   : > { %p149_p9 = pnand %p421_p7, %p148_p8 }
   0xd   : > { %p175_p10 = scmp.lt.s32.totalorder (!%p149_p9), %s607_s16, 1  ;;  %s172_s9 = sand.u32 (!%p149_p9), 1, %s551_s13  }
   0xe   : > { %152 = sbr.rel (%p149_p9) target bundleno = 212 (0xd4), region = 32  ;;  %s422_s10 = sshll.u32 (!%p149_p9), %s172_s9, 6 }
   0xf   : > { %s174_s11 = scalar_lea.vmem (!%p149_p9), [#allocation2], %s422_s10  ;;  %s435_s17 = sshll.u32 (!%p149_p9), %s607_s16, 10 }
  0x10   : > { %s347_s19 = sshll.u32 (!%p149_p9), %s174_s11, 4  ;;  %s563_s27 = smov (!%p149_p9), [#allocation2]   ;;  %s661_s19 = int_to_ptr.vmem [resolvable:$true] %s347_s19 }
  0x11   : > { %s499_s26 = scalar_lea.vmem (!%p149_p9), %s661_s19, 1024 }
  0x12   : > { %p500_p11 = scmp.ne.s32.totalorder (!%p149_p9), %s661_s19, %s499_s26 }
  0x13   : > { %v561_v0 = vmov 0   ;;  %s636_s24 = scalar_select %p175_p10, %s607_s16, 1  ;;  %v562_v9 = vmov 1   ;;  %v426_v18 = vld [vmem:[%s707_s2] ss:$0 sm:$0xff] }
  0x14   : > { %480 = vset.pattern.permute.xlu1 %v561_v0  ;;  %479 = vset.pattern.permute.xlu0 %v561_v0  ;;  %v427_v19 = vld [vmem:[%s707_s2 + $0x1] ss:$0 sm:$0xff]  ;;  %s665_s16 = scalar_lea.sflag [#allocation3], %s172_s9  ;;  %p501_p12 = pnand %p500_p11, %p624_p5 }
  0x15   : > { %s434_s25 = sshll.u32 %s636_s24, 6  ;;  %s182_s8 = scalar_lea.vmem %s706_s1, %s636_s24 }
  0x16   : > { %s179_s28 = scalar_lea.vmem %s705_s0, %s434_s25  ;;  %v428_v26 = vld [vmem:[%s182_s8] ss:$0 sm:$0xff]  ;;  %s659_s25 = scalar_lea.hbm %s708_s3, %s435_s17 }
  0x17   : > { %v185_v1 = vld [vmem:[%s179_s28 + $0x10] sm:$0xff]  ;;  %v183_v2 = vld [vmem:[%s179_s28] sm:$0xff]  ;;  %v186_v3 = vld [vmem:[%s179_s28 + $0x18] sm:$0xff]  ;;  %p502_p13 = pneg %p501_p12 }
  0x18   : > { %207 = vperm.xlu1 %480, %v185_v1   ;;  %197 = vperm.xlu0 %479, %v183_v2   ;;  %v184_v4 = vld [vmem:[%s179_s28 + $0x8] sm:$0xff]  ;;  %v187_v6 = vld [vmem:[%s179_s28 + $0x20] sm:$0xff]  ;;  %v190_v7 = vld [vmem:[%s179_s28 + $0x38] sm:$0xff] }
  0x19   : > { %v188_v5 = vld [vmem:[%s179_s28 + $0x28] sm:$0xff]  ;;  %v189_v8 = vld [vmem:[%s179_s28 + $0x30] sm:$0xff]  ;;  %s503_s28 = sshll.u32 %s563_s27, 4  ;;  %s504_s28 = int_to_ptr.vmem [resolvable:$false] %s503_s28 }
  0x1a   : > { %s505_s29 = scalar_lea.vmem %s504_s28, 2048  ;;  %p506_p0 = scmp.lt.s32.totalorder %s661_s19, %s504_s28 }
  0x1b   : > { %p507_p1 = scmp.lt.s32.totalorder %s505_s29, %s499_s26 }
  0x1c   : > { %212 = vperm.xlu1 %480, %v186_v3   ;;  %202 = vperm.xlu0 %479, %v184_v4  }
  0x1d   : > { %p508_p2 = por %p507_p1, %p506_p0 }
  0x1f   : > { %p509_p3 = pnand %p508_p2, %p502_p13 }
  0x20   : > { %222 = vperm.xlu1 %480, %v188_v5   ;;  %217 = vperm.xlu0 %479, %v187_v6  }
  0x24   : > { %232 = vperm.xlu1 %480, %v190_v7   ;;  %227 = vperm.xlu0 %479, %v189_v8  }
  0x28   : > { %482 = vset.pattern.permute.xlu1 %v562_v9  ;;  %481 = vset.pattern.permute.xlu0 %v562_v9 }
  0x29   : > { %254 = vperm.xlu1 %482, %v184_v4   ;;  %250 = vperm.xlu0 %481, %v183_v2  }
  0x2d   : > { %258 = vperm.xlu1 %482, %v185_v1   ;;  %262 = vperm.xlu0 %481, %v186_v3  }
  0x31   : > { %266 = vperm.xlu1 %482, %v187_v6   ;;  %270 = vperm.xlu0 %481, %v188_v5  }
  0x35   : > { %274 = vperm.xlu1 %482, %v189_v8   ;;  %278 = vperm.xlu0 %481, %v190_v7  }
  0x93   : > { %v208_v10 = vpop.permute.xlu1 %207  ;;  %v198_v11 = vpop.permute.xlu0 %197 }
  0x94   : > { %v241_v22 = vmul.f32 %v426_v18, %v198_v11  ;;  %v243_v29 = vmul.f32 %v426_v18, %v208_v10 }
  0x97   : > { %v213_v12 = vpop.permute.xlu1 %212  ;;  %v203_v13 = vpop.permute.xlu0 %202 }
  0x98   : > { %v242_v23 = vmul.f32 %v426_v18, %v203_v13  ;;  %v244_v30 = vmul.f32 %v426_v18, %v213_v12 }
  0x9b   : > { %v223_v14 = vpop.permute.xlu1 %222  ;;  %v218_v15 = vpop.permute.xlu0 %217 }
  0x9c   : > { %v246_v39 = vmul.f32 %v426_v18, %v223_v14  ;;  %v245_v40 = vmul.f32 %v426_v18, %v218_v15 }
  0x9f   : > { %v233_v16 = vpop.permute.xlu1 %232  ;;  %v228_v17 = vpop.permute.xlu0 %227 }
  0xa0   : > { %v248_v49 = vmul.f32 %v426_v18, %v233_v16  ;;  %v247_v50 = vmul.f32 %v426_v18, %v228_v17 }
  0xa4   : > { %v255_v20 = vpop.permute.xlu1 %254  ;;  %v251_v21 = vpop.permute.xlu0 %250 }
  0xa5   : > { %v288_v24 = vmul.f32 %v427_v19, %v255_v20  ;;  %v287_v25 = vmul.f32 %v427_v19, %v251_v21 }
  0xa7   : > { %v296_v27 = vadd.f32 %v288_v24, %v242_v23  ;;  %v295_v28 = vadd.f32 %v287_v25, %v241_v22 }
  0xa8   : > { %v259_v31 = vpop.permute.xlu1 %258  ;;  %v263_v32 = vpop.permute.xlu0 %262 }
  0xa9   : > { %v310_v33 = vadd.f32 %v428_v26, %v296_v27  ;;  %v309_v34 = vadd.f32 %v428_v26, %v295_v28  ;;  %v289_v35 = vmul.f32 %v427_v19, %v259_v31  ;;  %v290_v36 = vmul.f32 %v427_v19, %v263_v32 }
  0xab   : > { %483 = vtanh.f32 %v310_v33  ;;  %v297_v37 = vadd.f32 %v289_v35, %v243_v29  ;;  %v298_v38 = vadd.f32 %v290_v36, %v244_v30 }
  0xac   : > { %485 = vtanh.f32 %v309_v34  ;;  %v267_v41 = vpop.permute.xlu1 %266  ;;  %v271_v42 = vpop.permute.xlu0 %270 }
  0xad   : > { %v311_v43 = vadd.f32 %v428_v26, %v297_v37  ;;  %v312_v44 = vadd.f32 %v428_v26, %v298_v38  ;;  %v291_v45 = vmul.f32 %v427_v19, %v267_v41  ;;  %v292_v46 = vmul.f32 %v427_v19, %v271_v42 }
  0xaf   : > { %487 = vtanh.f32 %v311_v43  ;;  %v299_v47 = vadd.f32 %v291_v45, %v245_v40  ;;  %v300_v48 = vadd.f32 %v292_v46, %v246_v39 }
  0xb0   : > { %489 = vtanh.f32 %v312_v44  ;;  %v275_v51 = vpop.permute.xlu1 %274  ;;  %v279_v52 = vpop.permute.xlu0 %278 }
  0xb1   : > { %v313_v53 = vadd.f32 %v428_v26, %v299_v47  ;;  %v314_v54 = vadd.f32 %v428_v26, %v300_v48  ;;  %v293_v55 = vmul.f32 %v427_v19, %v275_v51  ;;  %v294_v56 = vmul.f32 %v427_v19, %v279_v52 }
  0xb3   : > { %491 = vtanh.f32 %v313_v53  ;;  %v301_v57 = vadd.f32 %v293_v55, %v247_v50  ;;  %v302_v58 = vadd.f32 %v294_v56, %v248_v49 }
  0xb4   : > { %493 = vtanh.f32 %v314_v54 }
  0xb5   : > { %v315_v59 = vadd.f32 %v428_v26, %v301_v57  ;;  %v316_v60 = vadd.f32 %v428_v26, %v302_v58 }
  0xb7   : > { %495 = vtanh.f32 %v315_v59 }
  0xb8   : > { %v484_v61 = vpop.eup %483  ;;  %497 = vtanh.f32 %v316_v60 }
  0xb9   : > { %v486_v62 = vpop.eup %485  ;;  %326 = vst [vmem:[%s174_s11 + $0x8] sm:$0xff] %v484_v61 }
  0xba   : > { %325 = vst [vmem:[%s174_s11] sm:$0xff] %v486_v62 }
  0xbc   : > { %v488_v63 = vpop.eup %487 }
  0xbd   : > { %v490_v0 = vpop.eup %489  ;;  %327 = vst [vmem:[%s174_s11 + $0x10] sm:$0xff] %v488_v63 }
  0xbe   : > { %328 = vst [vmem:[%s174_s11 + $0x18] sm:$0xff] %v490_v0 }
  0xc0   : > { %v492_v1 = vpop.eup %491 }
  0xc1   : > { %v494_v2 = vpop.eup %493  ;;  %329 = vst [vmem:[%s174_s11 + $0x20] sm:$0xff] %v492_v1 }
  0xc2   : > { %330 = vst [vmem:[%s174_s11 + $0x28] sm:$0xff] %v494_v2 }
  0xc4   : > { %v496_v3 = vpop.eup %495 }
  0xc5   : > { %v498_v4 = vpop.eup %497  ;;  %331 = vst [vmem:[%s174_s11 + $0x30] sm:$0xff] %v496_v3 }
  0xc6   : > { %332 = vst [vmem:[%s174_s11 + $0x38] sm:$0xff] %v498_v4 }
  0xc7   : > { %512 = shalt.err (!%p509_p3)
}
  0xc8   : > { %s513_s30 = scalar_lea.hbm %s659_s25, 1024  ;;  %s517_s6 = scalar_lea.hbm %s708_s3, 2048 }
  0xc9   : > { %p514_p4 = scmp.ne.s32.totalorder %s659_s25, %s513_s30  ;;  %p518_p9 = scmp.lt.s32.totalorder %s659_s25, %s708_s3 }
  0xca   : > { %p519_p10 = scmp.lt.s32.totalorder %s517_s6, %s513_s30 }
  0xcb   : > { %p515_p7 = pnand %p514_p4, %p624_p5 }
  0xcc   : > { %p520_p11 = por %p519_p10, %p518_p9 }
  0xcd   : > { %p516_p8 = pneg %p515_p7 }
  0xcf   : > { %p521_p12 = pnand %p520_p11, %p516_p8 }
  0xd1   : > { %524 = shalt.err (!%p521_p12)
}
  0xd2   : > { %s564_s9 = smov 128   ;;  %s565_s10 = smov 8  }
  0xd3   : > { %436 = dma.vmem_to_hbm [thread:$0]  (%p624_p5), %s661_s19, 1024, %s659_s25, %s665_s16, %s564_s9, %s564_s9, %s565_s10  }
  0xd4 PF: > { %p442_p13 = scmp.ge.s32.totalorder %s559_s15, 2  ;;  %s362_s11 = sand.u32 1, %s547_s12  }
  0xd5   : > { %s363_s17 = scalar_lea.sflag [#allocation3], %s362_s11 }
  0xd6   : > { %p439_p0 = pnand %p442_p13, %p628_p6 }
  0xd8   : > { %p440_p1 = pneg %p439_p0 }
  0xda   : > { %542 = dma.done.wait (%p440_p1), %s363_s17, 1024  }
  0xdb   : > { %544 = vsyncadd (%p440_p1), %s363_s17, 4294966272  ;;  %p13_p2 = scmp.ge.s32.totalorder %s611_s18, 4   ;;  %s711_s12 = smov %s551_s13 }
  0xdc   : > { %s712_s13 = smov %s555_s14  ;;  %s713_s14 = smov %s622_s21 }
  0xdd   : > { %s714_s15 = smov %s611_s18  ;;  %15 = sbr.rel (!%p13_p2) target bundleno = 3 (0x3), region = 71 }
  0xe2   :  { %368 = vsyncpa [#allocation3], 1 }
  0xe3   :  { %370 = vsyncpa [#allocation3 + $0x1], 1 }

</bundles_post_ra>
